<compile_context>
chip_gen: v6e
topology: v6e:2x2x1
jax: 0.10.0
libtpu: 0.0.40
codegen_flags: <defaults>
</compile_context>

<pallas_src>
import jax
import jax.numpy as jnp
from jax.experimental import pallas as pl
from jax.experimental.pallas import tpu as pltpu


def _scale_shift_kernel(sb_ref, x_ref, o_ref):
    # sb_ref: (2,) float32 in SMEM -> [scale, bias] (scalar VLIW slot, free).
    scale = sb_ref[0]
    bias = sb_ref[1]
    # One VPU multiply-add per vreg; compute in f32, cast to the output dtype.
    o_ref[...] = (x_ref[...] * scale + bias).astype(o_ref.dtype)


def _round_up(a, b):
    return ((a + b - 1) // b) * b


def scale_and_shift(x, scale=1.0, bias=0.0, *,
                    target_block_bytes=8 << 20,
                    vmem_limit_bytes=48 << 20,
                    min_pallas_bytes=256 << 10,
                    donate_input=False):
    """Applies x * scale + bias elementwise. Preserves shape/dtype for floats."""
    dtype = x.dtype
    n = x.size
    itemsize = jnp.dtype(dtype).itemsize
    nbytes = n * itemsize

    # Integer inputs: defer to XLA so int*float promotion matches PyTorch
    # (result is a float array, like torch), instead of casting back to int.
    if not jnp.issubdtype(dtype, jnp.floating):
        return x * scale + bias

    # Native sublane granule for the dtype's (sublane, 128) packing.
    sub = {4: 8, 2: 16, 1: 32}.get(itemsize, 8)

    # Lane-dense last dim: prefer 512 lanes when it divides evenly and still
    # leaves at least one full sublane granule of rows; else 128; else ragged.
    if n % 512 == 0 and (n // 512) >= sub:
        lane = 512
    elif n % 128 == 0:
        lane = 128
    else:
        lane = 0  # ragged

    # Tiny or ragged inputs: XLA's fused elementwise op already sits at the
    # HBM roofline (1x read + 1x write). The Pallas path would only add fixed
    # launch cost (tiny) or pad/slice copies (ragged), so skip it.
    if lane == 0 or nbytes < min_pallas_bytes:
        return (x.astype(jnp.float32) * scale + bias).astype(dtype)

    rows = n // lane
    x2d = jnp.reshape(x, (rows, lane))  # contiguous reshape: free / aliasable

    # ~target_block_bytes per block, rounded to the sublane granule.
    tile_rows = max(sub, (target_block_bytes // (lane * itemsize)) // sub * sub)
    # Guarantee >= 2 grid steps when possible so v7x megacore can shard the
    # "parallel" axis across both TensorCores.
    tile_rows = min(tile_rows, _round_up(pl.cdiv(rows, 2), sub))
    if tile_rows >= rows:
        tile_rows = rows  # single full-extent block (always a legal block)
    grid = (pl.cdiv(rows, tile_rows),)

    sb = jnp.array([scale, bias], dtype=jnp.float32)

    out2d = pl.pallas_call(
        _scale_shift_kernel,
        out_shape=jax.ShapeDtypeStruct((rows, lane), dtype),
        grid=grid,
        in_specs=[
            pl.BlockSpec(memory_space=pltpu.MemorySpace.SMEM),  # [scale, bias]
            pl.BlockSpec((tile_rows, lane), lambda i: (i, 0)),  # x tile
        ],
        out_specs=pl.BlockSpec((tile_rows, lane), lambda i: (i, 0)),
        compiler_params=pltpu.CompilerParams(
            dimension_semantics=("parallel",),
            vmem_limit_bytes=vmem_limit_bytes),
        input_output_aliases=({1: 0} if donate_input else {}),
    )(sb, x2d)

    return jnp.reshape(out2d, x.shape)


if __name__ == "__main__":
    key = jax.random.PRNGKey(0)
    k0, k1, k2 = jax.random.split(key, 3)
    scale, bias = 2.5, -0.75

    # 1) Small NCHW input, forced through the Pallas kernel path (grid=(2,)).
    x = jax.random.normal(k0, (2, 4, 16, 16), dtype=jnp.float32)
    out = jax.block_until_ready(
        scale_and_shift(x, scale=scale, bias=bias, min_pallas_bytes=0))
    ref = x * scale + bias
    assert out.shape == x.shape and out.dtype == x.dtype
    assert jnp.allclose(out, ref, atol=1e-6, rtol=1e-6)

    # 2) Same input through the default dispatch (tiny -> XLA bypass).
    out_d = jax.block_until_ready(scale_and_shift(x, scale=scale, bias=bias))
    assert jnp.allclose(out_d, ref, atol=1e-6, rtol=1e-6)

    # 3) bf16 input forced through the kernel (16-row sublane granule).
    xb = jax.random.normal(k1, (2, 4, 16, 16), dtype=jnp.bfloat16)
    outb = jax.block_until_ready(
        scale_and_shift(xb, scale=scale, bias=bias, min_pallas_bytes=0))
    refb = (xb.astype(jnp.float32) * scale + bias).astype(jnp.bfloat16)
    assert outb.shape == xb.shape and outb.dtype == xb.dtype
    assert jnp.allclose(outb.astype(jnp.float32), refb.astype(jnp.float32),
                        atol=1e-2, rtol=1e-2)

    # 4) Ragged (non-multiple-of-128) shape -> roofline XLA fallback.
    xr = jax.random.normal(k2, (2, 3, 17, 19), dtype=jnp.float32)
    outr = jax.block_until_ready(scale_and_shift(xr, scale=scale, bias=bias))
    refr = xr * scale + bias
    assert outr.shape == xr.shape and outr.dtype == xr.dtype
    assert jnp.allclose(outr, refr, atol=1e-6, rtol=1e-6)

    print("KERNEL_OK")
</pallas_src>

<mosaic_0001>
module attributes {stable_mosaic.version = 11 : i64} {
  func.func @_scale_shift_kernel(%arg0: i32, %arg1: memref<2xf32, #tpu.memory_space<smem>>, %arg2: memref<8x128xf32, #tpu.memory_space<vmem>>, %arg3: memref<8x128xf32, #tpu.memory_space<vmem>>) attributes {dimension_semantics = [#tpu.dimension_semantics<parallel>], iteration_bounds = array<i64: 2>, scalar_prefetch = 0 : i64, scratch_operands = 0 : i64, tpu.core_type = #tpu.core_type<tc>, window_params = [{transform_indices = @transform_0, window_bounds = array<i64: 2>}, {transform_indices = @transform_1, window_bounds = array<i64: 8, 128>}, {transform_indices = @transform_2, window_bounds = array<i64: 8, 128>}]} {
    %c0 = arith.constant 0 : index
    %0 = memref.load %arg1[%c0] : memref<2xf32, #tpu.memory_space<smem>>
    %c1 = arith.constant 1 : index
    %1 = memref.load %arg1[%c1] : memref<2xf32, #tpu.memory_space<smem>>
    %c0_0 = arith.constant 0 : index
    %c0_1 = arith.constant 0 : index
    %2 = vector.load %arg2[%c0_0, %c0_1] : memref<8x128xf32, #tpu.memory_space<vmem>>, vector<8x128xf32>
    %3 = vector.broadcast %0 : f32 to vector<8x128xf32>
    %4 = arith.mulf %2, %3 : vector<8x128xf32>
    %5 = vector.broadcast %1 : f32 to vector<8x128xf32>
    %6 = arith.addf %4, %5 : vector<8x128xf32>
    %c0_2 = arith.constant 0 : index
    %c0_3 = arith.constant 0 : index
    %7 = vector.load %arg3[%c0_2, %c0_3] : memref<8x128xf32, #tpu.memory_space<vmem>>, vector<8x128xf32>
    tpu.vector_store %arg3[%c0_2, %c0_3], %6 {strides = array<i32>} : memref<8x128xf32, #tpu.memory_space<vmem>>, vector<8x128xf32>,
    return
  }
  func.func @transform_0(%arg0: i32) -> i32 {
    %c0_i32 = arith.constant 0 : i32
    %c0_i32_0 = arith.constant 0 : i32
    return %c0_i32 : i32
  }
  func.func @transform_1(%arg0: i32) -> (i32, i32) {
    %c0_i32 = arith.constant 0 : i32
    %c0_i32_0 = arith.constant 0 : i32
    return %arg0, %c0_i32 : i32, i32
  }
  func.func @transform_2(%arg0: i32) -> (i32, i32) {
    %c0_i32 = arith.constant 0 : i32
    %c0_i32_0 = arith.constant 0 : i32
    return %arg0, %c0_i32 : i32, i32
  }
}

</mosaic_0001>

<bundles_post_ra>
// kernel: tpu_custom_call.1
= control target key start
LH: loop header
LB: loop body
LE: loop exit
PB: predicated region body
PF: predicated region fallthrough
CT: control target
= control target key end

     0   :  { %7 = vsyncpa [#allocation5], 0  ;;  %s626_s0 = inlined_call_operand.hbm [shape: f32[2], index: 0, kind: input, shape index: {}]   ;;  %s627_s1 = inlined_call_operand.hbm [shape: f32[16,128], index: 1, kind: input, shape index: {}]   ;;  %s628_s2 = inlined_call_operand.hbm [shape: f32[16,128], index: 2, kind: output, shape index: {}]  }
   0x1   :  { %8 = vsyncpa [#allocation3], 0 }
   0x2   :  { %10 = vsyncpa [#allocation3 + $0x1], 0 }
   0x3   :  { %11 = vsyncpa [#allocation4], 0 }
   0x4   :  { %13 = vsyncpa [#allocation4 + $0x1], 0  ;;  %s474_s9 = smov 0   ;;  %s476_s10 = smov 0  }
   0x5   :  { %s478_s11 = smov 0   ;;  %s480_s12 = smov 0  }
   0x6 LB: > { %s495_s13 = sadd.s32 4294967295, %s454_s12   ;;  %s275_s14 = sadd.s32 4294967294, %s454_s12   ;;  %s454_s12 = sphi %s480_s12, %s648_s12   ;;  %s450_s11 = sphi %s478_s11, %s647_s11   ;;  %s446_s10 = sphi %s476_s10, %s646_s10   ;;  %s442_s9 = sphi %s474_s9, %s645_s9  }
   0x7   : > { %p60_p0 = scmp.ne.s32.totalorder %s446_s10, %s442_s9  ;;  %p629_p1 = scmp.eq.s32.totalorder %s495_s13, 0 }
   0x8   : > { %p84_p2 = scmp.eq.s32.totalorder %s495_s13, 1  ;;  %p90_p3 = scmp.eq.s32.totalorder %s275_s14, 1 }
   0x9   : > { %p504_p4 = por %p629_p1, %p60_p0  ;;  %p276_p5 = scmp.ge.s32.totalorder %s454_s12, 1 }
   0xa   : > { %p509_p6 = por %p90_p3, %p60_p0  ;;  %p97_p7 = scmp.lt.s32.totalorder %s454_s12, 3 }
   0xb   : > { %s633_s15 = scalar_select %p504_p4, 1, 0 }
   0xc   : > { %s634_s16 = scalar_select %p509_p6, 1, 0 }
   0xd   : > { %p514_p8 = pnand %p276_p5, %p97_p7  ;;  %s520_s18 = sadd.s32 1, %s454_s12  }
   0xe   : > { %s44_s19 = ssub.s32 %s454_s12, %s520_s18  ;;  %s47_s20 = sadd.s32 1, %s450_s11 }
   0xf   : > { %s635_s17 = scalar_select %p514_p8, 1, 0 }
  0x10   : > { %p298_p10 = pneg %p514_p8  ;;  %p45_p12 = scmp.eq.s32.totalorder %s44_s19, 0 }
  0x11   : > { %p54_p13 = scmp.ne.s32.totalorder %s450_s11, %s446_s10  ;;  %p55_p0 = scmp.eq.s32.totalorder %s454_s12, 0 }
  0x12   : > { %p299_p11 = pnand %p298_p10, %p629_p1  ;;  %p311_p3 = scmp.lt.s32.totalorder %s454_s12, 2 }
  0x13   : > { %s456_s21 = smov [#allocation2]   ;;  %p56_p5 = por %p55_p0, %p54_p13 }
  0x14   : > { %301 = dma.hbm_to_smem (!%p299_p11), %s626_s0, 16, %s456_s21, [#allocation5]  }
  0x15   : > { %s537_s24 = scalar_select %p45_p12, %s450_s11, %s47_s20  }
  0x16   : > { %p541_p7 = por %p84_p2, %p54_p13  ;;  %s119_s26 = sand.u32 1, %s450_s11  }
  0x17   : > { %s280_s27 = sshll.u32 %s454_s12, 7  ;;  %s279_s28 = sshll.u32 %s119_s26, 3 }
  0x18   : > { %s636_s25 = scalar_select %p541_p7, 1, 0 }
  0x19   : > { %s550_s3 = scalar_lea.hbm %s627_s1, %s280_s27  ;;  %s123_s4 = scalar_lea.vmem [#allocation6], %s279_s28 }
  0x1a   : > { %s130_s5 = sshll.u32 %s123_s4, 4  ;;  %p552_p10 = pnand %p311_p3, %p56_p5  ;;  %s131_s5 = int_to_ptr.vmem [resolvable:$true] %s130_s5 }
  0x1b   : > { %s120_s7 = scalar_lea.sflag [#allocation3], %s119_s26  ;;  %s358_s8 = scalar_lea.hbm %s550_s3, 128 }
  0x1c   : > { %p359_p2 = scmp.ne.s32.totalorder %s550_s3, %s358_s8  ;;  %p360_p11 = pneg %p552_p10 }
  0x1d   : > { %s363_s20 = scalar_lea.hbm %s627_s1, 256  ;;  %p364_p0 = scmp.lt.s32.totalorder %s550_s3, %s627_s1 }
  0x1e   : > { %p361_p12 = pnand %p360_p11, %p359_p2  ;;  %p365_p3 = scmp.lt.s32.totalorder %s363_s20, %s358_s8 }
  0x20   : > { %p362_p13 = pneg %p361_p12  ;;  %p366_p5 = por %p365_p3, %p364_p0 }
  0x22   : > { %p367_p9 = pnand %p366_p5, %p362_p13 }
  0x24   : > { %370 = shalt.err (!%p367_p9)
}
  0x25   : > { %s371_s23 = scalar_lea.vmem %s131_s5, 128  ;;  %s457_s26 = smov [#allocation6]  }
  0x26   : > { %p372_p1 = scmp.ne.s32.totalorder %s131_s5, %s371_s23  ;;  %s376_s27 = sshll.u32 %s457_s26, 4  ;;  %s377_s27 = int_to_ptr.vmem [resolvable:$false] %s376_s27 }
  0x27   : > { %s378_s28 = scalar_lea.vmem %s377_s27, 256  ;;  %p379_p2 = scmp.lt.s32.totalorder %s131_s5, %s377_s27 }
  0x28   : > { %p374_p6 = pnand %p372_p1, %p360_p11  ;;  %p380_p12 = scmp.lt.s32.totalorder %s378_s28, %s371_s23 }
  0x2a   : > { %p375_p7 = pneg %p374_p6  ;;  %p381_p4 = por %p380_p12, %p379_p2 }
  0x2c   : > { %p382_p8 = pnand %p381_p4, %p375_p7 }
  0x2e   : > { %385 = shalt.err (!%p382_p8)
}
  0x2f   : > { %305 = dma.hbm_to_vmem [thread:$0]  (!%p552_p10), %s550_s3, 128, %s131_s5, %s120_s7  }
  0x30   : > { %p638_p13 = scmp.ne.s32.totalorder %s635_s17, 0 }
  0x31   : > { %p639_p9 = scmp.eq.s32.totalorder (!%p638_p13), %s495_s13, 0 }
  0x32   : > { %139 = sbr.rel (%p638_p13) target bundleno = 88 (0x58), region = 28 }
  0x37   : > { %429 = dma.done.wait (%p639_p9), [#allocation5], 16   ;;  %p640_p1 = pmov %p639_p9 }
  0x38   : > { %s577_s29 = sand.u32 1, %s446_s10   ;;  %p641_p4 = scmp.ne.s32.totalorder %s633_s15, 0 }
  0x39   : > { %431 = vsyncadd (%p640_p1), [#allocation5], 4294967280  ;;  %s283_s30 = sshll.u32 %s577_s29, 3  ;;  %s146_s4 = scalar_lea.sflag [#allocation3], %s577_s29 }
  0x3a   : > { %s149_s6 = scalar_lea.vmem [#allocation6], %s283_s30 }
  0x3b   : > { %433 = dma.done.wait (%p641_p4), %s146_s4, 128  }
  0x3c   : > { %435 = vsyncadd (%p641_p4), %s146_s4, 4294967168 }
  0x3d   : > { %154 = sfence }
  0x3e   : > { %s171_s17 = sld [smem:[#allocation2]]  ;;  %v173_v0 = vld [vmem:[%s149_s6] sm:$0xff]  ;;  %s170_s5 = scalar_lea.vmem [#allocation7], %s283_s30 }
  0x3f   : > { %s285_s3 = sld [smem:[#allocation2 + $0x1]]  ;;  %s193_s7 = sshll.u32 %s170_s5, 4  ;;  %s586_s7 = int_to_ptr.vmem [resolvable:$true] %s193_s7 }
  0x40   : > { %s287_s8 = sshll.u32 %s495_s13, 7  ;;  %s180_s20 = scalar_lea.sflag [#allocation4], %s577_s29 }
  0x41   : > { %s191_s19 = scalar_lea.hbm %s628_s2, %s287_s8  ;;  %s386_s21 = scalar_lea.vmem %s586_s7, 128 }
  0x42   : > { %p387_p6 = scmp.ne.s32.totalorder %s586_s7, %s386_s21  ;;  %p642_p8 = scmp.ne.s32.totalorder %s636_s25, 0 }
  0x43   : > { %s458_s13 = smov [#allocation7]  }
  0x44   : > { %v174_v1 = vstv %s171_s17  ;;  %p388_p7 = pnand %p387_p6, %p642_p8  ;;  %s390_s22 = sshll.u32 %s458_s13, 4  ;;  %s391_s22 = int_to_ptr.vmem [resolvable:$false] %s390_s22 }
  0x45   : > { %v175_v2 = vmul.f32 %v174_v1, %v173_v0  ;;  %v176_v3 = vstv %s285_s3  ;;  %s392_s23 = scalar_lea.vmem %s391_s22, 256  ;;  %p393_p11 = scmp.lt.s32.totalorder %s586_s7, %s391_s22 }
  0x46   : > { %p389_p10 = pneg %p388_p7  ;;  %p394_p0 = scmp.lt.s32.totalorder %s392_s23, %s386_s21 }
  0x47   : > { %v177_v4 = vadd.f32 %v176_v3, %v175_v2 }
  0x48   : > { %p395_p3 = por %p394_p0, %p393_p11 }
  0x49   : > { %178 = vst [vmem:[%s170_s5] sm:$0xff] %v177_v4 }
  0x4a   : > { %p396_p5 = pnand %p395_p3, %p389_p10 }
  0x4c   : > { %399 = shalt.err (!%p396_p5)
}
  0x4d   : > { %s400_s26 = scalar_lea.hbm %s191_s19, 128  ;;  %s404_s29 = scalar_lea.hbm %s628_s2, 256 }
  0x4e   : > { %p401_p2 = scmp.ne.s32.totalorder %s191_s19, %s400_s26  ;;  %p405_p9 = scmp.lt.s32.totalorder %s191_s19, %s628_s2 }
  0x4f   : > { %p406_p1 = scmp.lt.s32.totalorder %s404_s29, %s400_s26 }
  0x50   : > { %p402_p12 = pnand %p401_p2, %p642_p8 }
  0x51   : > { %p407_p4 = por %p406_p1, %p405_p9 }
  0x52   : > { %p403_p13 = pneg %p402_p12 }
  0x54   : > { %p408_p6 = pnand %p407_p4, %p403_p13 }
  0x56   : > { %411 = shalt.err (!%p408_p6)
}
  0x57   : > { %296 = dma.vmem_to_hbm [thread:$0]  (%p642_p8), %s586_s7, 128, %s191_s19, %s180_s20  }
  0x58 PF: > { %s205_s6 = sand.u32 1, %s442_s9   ;;  %p643_p7 = scmp.ne.s32.totalorder %s634_s16, 0 }
  0x59   : > { %p644_p10 = scmp.ge.s32.totalorder %s454_s12, 2  ;;  %s206_s17 = scalar_lea.sflag [#allocation4], %s205_s6 }
  0x5b   : > { %p307_p11 = pnand %p644_p10, %p643_p7 }
  0x5d   : > { %p308_p0 = pneg %p307_p11 }
  0x5f   : > { %437 = dma.done.wait (%p308_p0), %s206_s17, 128  }
  0x60   : > { %439 = vsyncadd (%p308_p0), %s206_s17, 4294967168  ;;  %p16_p3 = scmp.ge.s32.totalorder %s520_s18, 4   ;;  %s645_s9 = smov %s446_s10 }
  0x61   : > { %s646_s10 = smov %s450_s11  ;;  %s647_s11 = smov %s537_s24 }
  0x62   : > { %s648_s12 = smov %s520_s18  ;;  %18 = sbr.rel (!%p16_p3) target bundleno = 6 (0x6), region = 78 }
  0x67   :  { %211 = vsyncpa [#allocation3], 1 }
  0x68   :  { %213 = vsyncpa [#allocation3 + $0x1], 1 }
  0x69   :  { %214 = vsyncpa [#allocation4], 1 }
  0x6a   :  { %216 = vsyncpa [#allocation4 + $0x1], 1 }
  0x6b   :  { %217 = vsyncpa [#allocation5], 1 }
  0x6c   :  { %219 = vsyncpa [#allocation5 + $0x1], 1 }

</bundles_post_ra>
